<compile_context>
chip_gen: v5e
topology: v5e:2x2
jax: 0.10.0
libtpu: 0.0.40
codegen_flags: <defaults>
</compile_context>

<pallas_src>
import jax
import jax.numpy as jnp
from jax.experimental import pallas as pl
from jax.experimental.pallas import tpu as pltpu

_BN_EPS = 1e-5
_LEAKY_SLOPE = 0.2

_VMEM_SPEC = pl.BlockSpec(memory_space=pltpu.MemorySpace.VMEM)


def _make_fused_mlp_kernel(num_hidden_layers):
    """Fused kernel for `num_hidden_layers` [Linear + BN(batch stats) + LeakyReLU]
    blocks followed by one Linear(., 1).

    Ref order: x, (w, b, gamma, beta) * num_hidden_layers, w_final, b_final, out
    All refs are whole (small) arrays resident in VMEM; no grid."""

    def kernel(*refs):
        x_ref, o_ref = refs[0], refs[-1]
        p = refs[1:-1]

        h = x_ref[...]                                     # (N, F0), f32
        n = h.shape[0]
        inv_n = 1.0 / n

        idx = 0
        for _ in range(num_hidden_layers):                 # static unroll over layers
            w_ref, b_ref, gamma_ref, beta_ref = p[idx:idx + 4]
            idx += 4

            # Linear (MXU, f32 accumulate)
            y = jnp.dot(h, w_ref[...], preferred_element_type=jnp.float32) + b_ref[...]

            # BatchNorm1d, training-mode semantics: biased variance over the batch.
            mean = jnp.sum(y, axis=0, keepdims=True) * inv_n           # (1, Fout)
            centered = y - mean
            var = jnp.sum(centered * centered, axis=0, keepdims=True) * inv_n
            scale = gamma_ref[...] * jax.lax.rsqrt(var + _BN_EPS)      # fold gamma
            z = centered * scale + beta_ref[...]

            # LeakyReLU(0.2)
            h = jnp.where(z > 0, z, _LEAKY_SLOPE * z)

        # Final Linear(in_channel, 1)
        wf_ref, bf_ref = p[idx], p[idx + 1]
        o_ref[...] = (jnp.dot(h, wf_ref[...], preferred_element_type=jnp.float32)
                      + bf_ref[...]).astype(o_ref.dtype)

    return kernel


@jax.jit
def binary_model_forward(x, params):
    """params: list of dicts. Hidden layers: {'w','b','gamma','beta'}; final: {'w','b'}.
    Returns shape (N,), matching .squeeze(1)."""
    hidden_params, final_params = params[:-1], params[-1]
    num_hidden = len(hidden_params)

    flat_args = [x]
    for p in hidden_params:
        flat_args += [p["w"], p["b"], p["gamma"], p["beta"]]
    flat_args += [final_params["w"], final_params["b"]]

    n = x.shape[0]
    out = pl.pallas_call(
        _make_fused_mlp_kernel(num_hidden),
        out_shape=jax.ShapeDtypeStruct((n, 1), jnp.float32),
        in_specs=[_VMEM_SPEC] * len(flat_args),
        out_specs=_VMEM_SPEC,
    )(*flat_args)

    return out[:, 0]  # squeeze(1)


def init_params(key, d, hidden):
    """Deterministic init mirroring PyTorch defaults:
    Linear: W, b ~ U(-1/sqrt(fan_in), 1/sqrt(fan_in)); BN: gamma=1, beta=0.
    Note: weights are stored (in, out); loading real PyTorch weights would need W.T."""
    params = []
    in_c = d
    for out_c in hidden:
        key, kw, kb = jax.random.split(key, 3)
        bound = 1.0 / jnp.sqrt(in_c)
        params.append({
            "w": jax.random.uniform(kw, (in_c, out_c), jnp.float32, -bound, bound),
            "b": jax.random.uniform(kb, (1, out_c), jnp.float32, -bound, bound),
            "gamma": jnp.ones((1, out_c), jnp.float32),
            "beta": jnp.zeros((1, out_c), jnp.float32),
        })
        in_c = out_c
    key, kw, kb = jax.random.split(key, 3)
    bound = 1.0 / jnp.sqrt(in_c)
    params.append({
        "w": jax.random.uniform(kw, (in_c, 1), jnp.float32, -bound, bound),
        "b": jax.random.uniform(kb, (1, 1), jnp.float32, -bound, bound),
    })
    return params


if __name__ == "__main__":
    key = jax.random.PRNGKey(0)
    k_x, k_p = jax.random.split(key)

    batch, d = 8, 16
    hidden = [32, 16]

    x = jax.random.normal(k_x, (batch, d), jnp.float32)
    params = init_params(k_p, d, hidden)

    out = binary_model_forward(x, params)
    out = jax.block_until_ready(out)
    assert out.shape == (batch,), out.shape
    assert bool(jnp.all(jnp.isfinite(out)))

    print("KERNEL_OK")
</pallas_src>

<mosaic_0001>
module attributes {stable_mosaic.version = 11 : i64} {
  func.func @kernel(%arg0: memref<8x16xf32, #tpu.memory_space<vmem>>, %arg1: memref<16x32xf32, #tpu.memory_space<vmem>>, %arg2: memref<1x32xf32, #tpu.memory_space<vmem>>, %arg3: memref<1x32xf32, #tpu.memory_space<vmem>>, %arg4: memref<1x32xf32, #tpu.memory_space<vmem>>, %arg5: memref<32x16xf32, #tpu.memory_space<vmem>>, %arg6: memref<1x16xf32, #tpu.memory_space<vmem>>, %arg7: memref<1x16xf32, #tpu.memory_space<vmem>>, %arg8: memref<1x16xf32, #tpu.memory_space<vmem>>, %arg9: memref<16x1xf32, #tpu.memory_space<vmem>>, %arg10: memref<1x1xf32, #tpu.memory_space<vmem>>, %arg11: memref<8x1xf32, #tpu.memory_space<vmem>>) attributes {dimension_semantics = [], scalar_prefetch = 0 : i64, scratch_operands = 0 : i64, tpu.core_type = #tpu.core_type<tc>} {
    %c0 = arith.constant 0 : index
    %c0_0 = arith.constant 0 : index
    %0 = vector.load %arg0[%c0, %c0_0] : memref<8x16xf32, #tpu.memory_space<vmem>>, vector<8x16xf32>
    %c0_1 = arith.constant 0 : index
    %c0_2 = arith.constant 0 : index
    %1 = vector.load %arg1[%c0_1, %c0_2] : memref<16x32xf32, #tpu.memory_space<vmem>>, vector<16x32xf32>
    %cst = arith.constant dense<0.000000e+00> : vector<8x32xf32>
    %2 = tpu.matmul %0, %1, %cst {dimension_numbers = #tpu.dot_dimension_numbers<[1], [0], [0], [1], [0, 0, 1, 1], [], []>} : vector<8x16xf32>, vector<16x32xf32>, vector<8x32xf32> -> vector<8x32xf32>
    %c0_3 = arith.constant 0 : index
    %c0_4 = arith.constant 0 : index
    %3 = vector.load %arg2[%c0_3, %c0_4] : memref<1x32xf32, #tpu.memory_space<vmem>>, vector<1x32xf32>
    %4 = vector.broadcast %3 : vector<1x32xf32> to vector<8x32xf32>
    %5 = arith.addf %2, %4 : vector<8x32xf32>
    %cst_5 = arith.constant dense<0.000000e+00> : vector<32xf32>
    %6 = vector.multi_reduction <add>, %5, %cst_5 [0] : vector<8x32xf32> to vector<32xf32>
    %7 = vector.shape_cast %6 : vector<32xf32> to vector<1x32xf32>
    %cst_6 = arith.constant 1.250000e-01 : f32
    %8 = vector.broadcast %cst_6 : f32 to vector<1x32xf32>
    %9 = arith.mulf %7, %8 : vector<1x32xf32>
    %10 = vector.broadcast %9 : vector<1x32xf32> to vector<8x32xf32>
    %11 = arith.subf %5, %10 : vector<8x32xf32>
    %12 = arith.mulf %11, %11 : vector<8x32xf32>
    %cst_7 = arith.constant dense<0.000000e+00> : vector<32xf32>
    %13 = vector.multi_reduction <add>, %12, %cst_7 [0] : vector<8x32xf32> to vector<32xf32>
    %14 = vector.shape_cast %13 : vector<32xf32> to vector<1x32xf32>
    %cst_8 = arith.constant 1.250000e-01 : f32
    %15 = vector.broadcast %cst_8 : f32 to vector<1x32xf32>
    %16 = arith.mulf %14, %15 : vector<1x32xf32>
    %c0_9 = arith.constant 0 : index
    %c0_10 = arith.constant 0 : index
    %17 = vector.load %arg3[%c0_9, %c0_10] : memref<1x32xf32, #tpu.memory_space<vmem>>, vector<1x32xf32>
    %cst_11 = arith.constant 9.99999974E-6 : f32
    %18 = vector.broadcast %cst_11 : f32 to vector<1x32xf32>
    %19 = arith.addf %16, %18 : vector<1x32xf32>
    %20 = math.rsqrt %19 : vector<1x32xf32>
    %21 = arith.mulf %17, %20 : vector<1x32xf32>
    %22 = vector.broadcast %21 : vector<1x32xf32> to vector<8x32xf32>
    %23 = arith.mulf %11, %22 : vector<8x32xf32>
    %c0_12 = arith.constant 0 : index
    %c0_13 = arith.constant 0 : index
    %24 = vector.load %arg4[%c0_12, %c0_13] : memref<1x32xf32, #tpu.memory_space<vmem>>, vector<1x32xf32>
    %25 = vector.broadcast %24 : vector<1x32xf32> to vector<8x32xf32>
    %26 = arith.addf %23, %25 : vector<8x32xf32>
    %cst_14 = arith.constant 0.000000e+00 : f32
    %27 = vector.broadcast %cst_14 : f32 to vector<8x32xf32>
    %28 = arith.cmpf ogt, %26, %27 : vector<8x32xf32>
    %cst_15 = arith.constant 2.000000e-01 : f32
    %29 = vector.broadcast %cst_15 : f32 to vector<8x32xf32>
    %30 = arith.mulf %29, %26 : vector<8x32xf32>
    %31 = arith.select %28, %26, %30 : vector<8x32xi1>, vector<8x32xf32>
    %c0_16 = arith.constant 0 : index
    %c0_17 = arith.constant 0 : index
    %32 = vector.load %arg5[%c0_16, %c0_17] : memref<32x16xf32, #tpu.memory_space<vmem>>, vector<32x16xf32>
    %cst_18 = arith.constant dense<0.000000e+00> : vector<8x16xf32>
    %33 = tpu.matmul %31, %32, %cst_18 {dimension_numbers = #tpu.dot_dimension_numbers<[1], [0], [0], [1], [0, 0, 1, 1], [], []>} : vector<8x32xf32>, vector<32x16xf32>, vector<8x16xf32> -> vector<8x16xf32>
    %c0_19 = arith.constant 0 : index
    %c0_20 = arith.constant 0 : index
    %34 = vector.load %arg6[%c0_19, %c0_20] : memref<1x16xf32, #tpu.memory_space<vmem>>, vector<1x16xf32>
    %35 = vector.broadcast %34 : vector<1x16xf32> to vector<8x16xf32>
    %36 = arith.addf %33, %35 : vector<8x16xf32>
    %cst_21 = arith.constant dense<0.000000e+00> : vector<16xf32>
    %37 = vector.multi_reduction <add>, %36, %cst_21 [0] : vector<8x16xf32> to vector<16xf32>
    %38 = vector.shape_cast %37 : vector<16xf32> to vector<1x16xf32>
    %cst_22 = arith.constant 1.250000e-01 : f32
    %39 = vector.broadcast %cst_22 : f32 to vector<1x16xf32>
    %40 = arith.mulf %38, %39 : vector<1x16xf32>
    %41 = vector.broadcast %40 : vector<1x16xf32> to vector<8x16xf32>
    %42 = arith.subf %36, %41 : vector<8x16xf32>
    %43 = arith.mulf %42, %42 : vector<8x16xf32>
    %cst_23 = arith.constant dense<0.000000e+00> : vector<16xf32>
    %44 = vector.multi_reduction <add>, %43, %cst_23 [0] : vector<8x16xf32> to vector<16xf32>
    %45 = vector.shape_cast %44 : vector<16xf32> to vector<1x16xf32>
    %cst_24 = arith.constant 1.250000e-01 : f32
    %46 = vector.broadcast %cst_24 : f32 to vector<1x16xf32>
    %47 = arith.mulf %45, %46 : vector<1x16xf32>
    %c0_25 = arith.constant 0 : index
    %c0_26 = arith.constant 0 : index
    %48 = vector.load %arg7[%c0_25, %c0_26] : memref<1x16xf32, #tpu.memory_space<vmem>>, vector<1x16xf32>
    %cst_27 = arith.constant 9.99999974E-6 : f32
    %49 = vector.broadcast %cst_27 : f32 to vector<1x16xf32>
    %50 = arith.addf %47, %49 : vector<1x16xf32>
    %51 = math.rsqrt %50 : vector<1x16xf32>
    %52 = arith.mulf %48, %51 : vector<1x16xf32>
    %53 = vector.broadcast %52 : vector<1x16xf32> to vector<8x16xf32>
    %54 = arith.mulf %42, %53 : vector<8x16xf32>
    %c0_28 = arith.constant 0 : index
    %c0_29 = arith.constant 0 : index
    %55 = vector.load %arg8[%c0_28, %c0_29] : memref<1x16xf32, #tpu.memory_space<vmem>>, vector<1x16xf32>
    %56 = vector.broadcast %55 : vector<1x16xf32> to vector<8x16xf32>
    %57 = arith.addf %54, %56 : vector<8x16xf32>
    %cst_30 = arith.constant 0.000000e+00 : f32
    %58 = vector.broadcast %cst_30 : f32 to vector<8x16xf32>
    %59 = arith.cmpf ogt, %57, %58 : vector<8x16xf32>
    %cst_31 = arith.constant 2.000000e-01 : f32
    %60 = vector.broadcast %cst_31 : f32 to vector<8x16xf32>
    %61 = arith.mulf %60, %57 : vector<8x16xf32>
    %62 = arith.select %59, %57, %61 : vector<8x16xi1>, vector<8x16xf32>
    %c0_32 = arith.constant 0 : index
    %c0_33 = arith.constant 0 : index
    %63 = vector.load %arg9[%c0_32, %c0_33] : memref<16x1xf32, #tpu.memory_space<vmem>>, vector<16x1xf32>
    %cst_34 = arith.constant dense<0.000000e+00> : vector<8x1xf32>
    %64 = tpu.matmul %62, %63, %cst_34 {dimension_numbers = #tpu.dot_dimension_numbers<[1], [0], [0], [1], [0, 0, 1, 1], [], []>} : vector<8x16xf32>, vector<16x1xf32>, vector<8x1xf32> -> vector<8x1xf32>
    %c0_35 = arith.constant 0 : index
    %c0_36 = arith.constant 0 : index
    %65 = vector.load %arg10[%c0_35, %c0_36] : memref<1x1xf32, #tpu.memory_space<vmem>>, vector<1x1xf32>
    %66 = vector.broadcast %65 : vector<1x1xf32> to vector<8x1xf32>
    %67 = arith.addf %64, %66 : vector<8x1xf32>
    %c0_37 = arith.constant 0 : index
    %c0_38 = arith.constant 0 : index
    %68 = vector.load %arg11[%c0_37, %c0_38] : memref<8x1xf32, #tpu.memory_space<vmem>>, vector<8x1xf32>
    tpu.vector_store %arg11[%c0_37, %c0_38], %67 {strides = array<i32>} : memref<8x1xf32, #tpu.memory_space<vmem>>, vector<8x1xf32>,
    return
  }
}

</mosaic_0001>

<bundles_post_ra>
// kernel: binary_model_forward.1
= control target key start
LH: loop header
LB: loop body
LE: loop exit
PB: predicated region body
PF: predicated region fallthrough
CT: control target
= control target key end

     0   :  { %vm47_vm0 = vcmask 130048   ;;  %vm71_vm1 = vcmask 261120   ;;  %vm218_vm10 = vcmask 7168   ;;  %s354_s1 = inlined_call_operand.vmem [shape: f32[16,32], index: 1, kind: input, shape index: {}]   ;;  %s355_s0 = inlined_call_operand.vmem [shape: f32[8,16], index: 0, kind: input, shape index: {}]   ;;  %s356_s2 = inlined_call_operand.vmem [shape: f32[1,32], index: 2, kind: input, shape index: {}]   ;;  %s357_s4 = inlined_call_operand.vmem [shape: f32[1,32], index: 4, kind: input, shape index: {}]   ;;  %s358_s6 = inlined_call_operand.vmem [shape: f32[1,16], index: 6, kind: input, shape index: {}]   ;;  %s359_s5 = inlined_call_operand.vmem [shape: f32[32,16], index: 5, kind: input, shape index: {}]   ;;  %s360_s3 = inlined_call_operand.vmem [shape: f32[1,32], index: 3, kind: input, shape index: {}]   ;;  %s361_s8 = inlined_call_operand.vmem [shape: f32[1,16], index: 8, kind: input, shape index: {}]   ;;  %s362_s9 = inlined_call_operand.vmem [shape: f32[16,1], index: 9, kind: input, shape index: {}]   ;;  %s363_s10 = inlined_call_operand.<no memory space> [shape: f32[1,1], index: 10, kind: input, shape index: {}]   ;;  %s364_s7 = inlined_call_operand.vmem [shape: f32[1,16], index: 7, kind: input, shape index: {}]   ;;  %s365_s11 = inlined_call_operand.vmem [shape: f32[8,1], index: 11, kind: output, shape index: {}]  }
   0x1   :  { %v42_v0 = vld [vmem:[%s354_s1 + $0x8] sm:$0xff]  ;;  %v41_v1 = vld [vmem:[%s354_s1] sm:$0xff]  ;;  %v118_v3 = vld [vmem:[%s359_s5 + $0x18] sm:$0xff] }
   0x2   :  { %65 = vmatpush.msra.mxu0 %v42_v0  ;;  %v40_v2 = vld [vmem:[%s355_s0] sm:$0xff]  ;;  %v117_v4 = vld [vmem:[%s359_s5 + $0x10] sm:$0xff]  ;;  %138 = vmatpush.msra.mxu1 %v118_v3  ;;  %v116_v5 = vld [vmem:[%s359_s5 + $0x8] sm:$0xff]  ;;  %v16_v3 = vstv %s363_s10 }
   0x3   :  { %v115_v6 = vld [vmem:[%s359_s5] sm:$0xff]  ;;  %v190_v62 = vld [vmem:[%s362_s9 + $0x8] sm:$0xff]  ;;  %17 = vst [vmem:[#allocation2] sm:$0x1] %v16_v3 }
   0x4   :  { %66 = vmatpush.msra.mxu0 %v41_v1  ;;  %139 = vmatpush.msra.mxu1 %v117_v4  ;;  %v227_v7 = vld [vmem:[%s356_s2] ss:$0 sm:$0xff] }
   0x5   :  { %224 = vmatmul.msk.f32.vlgmr.msra.gmra.mxu0 %vm47_vm0, %v40_v2  ;;  %v90_v34 = vld [vmem:[%s360_s3] sm:$0x1]  ;;  %212 = vmatpush.msra.mxu2 %v190_v62 }
   0x6   :  { %140 = vmatpush.msra.mxu1 %v116_v5  ;;  %v228_v39 = vld [vmem:[%s357_s4] ss:$0 sm:$0xff] }
   0x7   :  { %v229_v44 = vld [vmem:[%s358_s6] ss:$0 sm:$0xff] }
   0x8   :  { %141 = vmatpush.msra.mxu1 %v115_v6  ;;  %v189_v63 = vld [vmem:[%s362_s9] sm:$0xff] }
   0x9   :  { %213 = vmatpush.msra.mxu2 %v189_v63 }
  0x82   :  { %v68_v8 = vpop.f32.mrf.mxu0 }
  0x83   :  { %v69_v9 = vadd.f32 %v227_v7, %v68_v8 }
  0x85   :  { %v72_v10 = vsel %vm71_vm1, %v69_v9, 0.0 }
  0x86   :  { %v73_v11 = vrot.slane %v72_v10, 4 }
  0x88   :  { %v74_v12 = vadd.f32 %v73_v11, %v72_v10  ;;  %v164_v10 = vld [vmem:[%s364_s7] sm:$0x1] }
  0x8a   :  { %v75_v13 = vrot.slane %v74_v12, 2 }
  0x8c   :  { %v76_v14 = vadd.f32 %v75_v13, %v74_v12 }
  0x8e   :  { %v77_v15 = vrot.slane %v76_v14, 1 }
  0x90   :  { %v78_v16 = vadd.f32 %v77_v15, %v76_v14  ;;  %v230_v15 = vld [vmem:[%s361_s8] ss:$0 sm:$0xff] }
  0x92   :  { %v79_v17 = vmul.f32 0.125, %v78_v16 }
  0x94   :  { %v80_v18 = vsub.f32 %v69_v9, %v79_v17 }
  0x96   :  { %v81_v19 = vmul.f32 %v80_v18, %v80_v18 }
  0x98   :  { %v82_v20 = vsel %vm71_vm1, %v81_v19, 0.0 }
  0x99   :  { %v83_v21 = vrot.slane %v82_v20, 4 }
  0x9b   :  { %v84_v22 = vadd.f32 %v83_v21, %v82_v20  ;;  %v231_v20 = vld [vmem:[#allocation2] ss:$0 sm:$0xff] }
  0x9d   :  { %v85_v23 = vrot.slane %v84_v22, 2 }
  0x9f   :  { %v86_v24 = vadd.f32 %v85_v23, %v84_v22 }
  0xa1   :  { %v87_v25 = vrot.slane %v86_v24, 1 }
  0xa3   :  { %v88_v26 = vadd.f32 %v87_v25, %v86_v24 }
  0xa5   :  { %v89_v27 = vmul.f32 0.125, %v88_v26 }
  0xa7   :  { %v91_v28 = vadd.f32 1e-05, %v89_v27 }
  0xa9   :  { %232 = vrsqrt.f32 %v91_v28  ;;  %vm98_vm3 = vweird.f32 %v91_v28 }
  0xaf   :  { %v233_v29 = vpop.eup %232 }
  0xb0   :  { %v93_v30 = vmul.f32 %v233_v29, %v91_v28  ;;  %vm99_vm2 = vweird.f32 %v233_v29 }
  0xb1   :  { %vm100_vm4 = vmor %vm98_vm3, %vm99_vm2 }
  0xb2   :  { %v94_v31 = vmul.f32 %v233_v29, %v93_v30 }
  0xb4   :  { %v95_v32 = vmul.f32 0.5, %v94_v31 }
  0xb6   :  { %v96_v33 = vsub.f32 1.5, %v95_v32 }
  0xb8   :  { %v97_v35 = vmul.f32 %v233_v29, %v96_v33 }
  0xba   :  { %v101_v36 = vsel %vm100_vm4, %v233_v29, %v97_v35 }
  0xbb   :  { %v102_v37 = vmul.f32 %v101_v36, %v90_v34 }
  0xbd   :  { %v104_v38 = vperm.slane %v102_v37, 0 }
  0xbf   :  { %v106_v40 = vmul.f32 %v104_v38, %v80_v18 }
  0xc1   :  { %v111_v41 = vadd.f32 %v228_v39, %v106_v40 }
  0xc3   :  { %vm112_vm5 = vcmp.gt.f32.partialorder %v111_v41, 0.0  ;;  %v113_v42 = vmul.f32 0.2, %v111_v41 }
  0xc5   :  { %v114_v43 = vsel %vm112_vm5, %v111_v41, %v113_v42 }
  0xc6   :  { %225 = vmatmul.msk.f32.vlgmr.msra.gmra.mxu1 %vm71_vm1, %v114_v43 }
 0x143   :  { %v143_v45 = vpop.f32.mrf.mxu1 }
 0x144   :  { %v144_v46 = vadd.f32 %v229_v44, %v143_v45 }
 0x146   :  { %v146_v47 = vsel %vm47_vm0, %v144_v46, 0.0 }
 0x147   :  { %v147_v48 = vrot.slane %v146_v47, 4 }
 0x149   :  { %v148_v49 = vadd.f32 %v147_v48, %v146_v47 }
 0x14b   :  { %v149_v50 = vrot.slane %v148_v49, 2 }
 0x14d   :  { %v150_v51 = vadd.f32 %v149_v50, %v148_v49 }
 0x14f   :  { %v151_v52 = vrot.slane %v150_v51, 1 }
 0x151   :  { %v152_v53 = vadd.f32 %v151_v52, %v150_v51 }
 0x153   :  { %v153_v54 = vmul.f32 0.125, %v152_v53 }
 0x155   :  { %v154_v55 = vsub.f32 %v144_v46, %v153_v54 }
 0x157   :  { %v155_v56 = vmul.f32 %v154_v55, %v154_v55 }
 0x159   :  { %v156_v57 = vsel %vm47_vm0, %v155_v56, 0.0 }
 0x15a   :  { %v157_v58 = vrot.slane %v156_v57, 4 }
 0x15c   :  { %v158_v59 = vadd.f32 %v157_v58, %v156_v57 }
 0x15e   :  { %v159_v60 = vrot.slane %v158_v59, 2 }
 0x160   :  { %v160_v61 = vadd.f32 %v159_v60, %v158_v59 }
 0x162   :  { %v161_v0 = vrot.slane %v160_v61, 1 }
 0x164   :  { %v162_v1 = vadd.f32 %v161_v0, %v160_v61 }
 0x166   :  { %v163_v2 = vmul.f32 0.125, %v162_v1 }
 0x168   :  { %v165_v4 = vadd.f32 1e-05, %v163_v2 }
 0x16a   :  { %234 = vrsqrt.f32 %v165_v4  ;;  %vm172_vm7 = vweird.f32 %v165_v4 }
 0x170   :  { %v235_v5 = vpop.eup %234 }
 0x171   :  { %v167_v6 = vmul.f32 %v235_v5, %v165_v4  ;;  %vm173_vm6 = vweird.f32 %v235_v5 }
 0x172   :  { %vm174_vm8 = vmor %vm172_vm7, %vm173_vm6 }
 0x173   :  { %v168_v7 = vmul.f32 %v235_v5, %v167_v6 }
 0x175   :  { %v169_v8 = vmul.f32 0.5, %v168_v7 }
 0x177   :  { %v170_v9 = vsub.f32 1.5, %v169_v8 }
 0x179   :  { %v171_v11 = vmul.f32 %v235_v5, %v170_v9 }
 0x17b   :  { %v175_v12 = vsel %vm174_vm8, %v235_v5, %v171_v11 }
 0x17c   :  { %v176_v13 = vmul.f32 %v175_v12, %v164_v10 }
 0x17e   :  { %v178_v14 = vperm.slane %v176_v13, 0 }
 0x180   :  { %v180_v16 = vmul.f32 %v178_v14, %v154_v55 }
 0x182   :  { %v185_v17 = vadd.f32 %v230_v15, %v180_v16 }
 0x184   :  { %vm186_vm9 = vcmp.gt.f32.partialorder %v185_v17, 0.0  ;;  %v187_v18 = vmul.f32 0.2, %v185_v17 }
 0x186   :  { %v188_v19 = vsel %vm186_vm9, %v185_v17, %v187_v18 }
 0x187   :  { %226 = vmatmul.msk.f32.vlgmr.msra.gmra.mxu2 %vm47_vm0, %v188_v19 }
 0x20a   :  { %v215_v21 = vpop.f32.mrf.mxu2 }
 0x20b   :  { %v216_v22 = vadd.f32 %v231_v20, %v215_v21 }
 0x20d   :  { %219 = vst.msk [vmem:[%s365_s11] sm:$0xff] %vm218_vm10, %v216_v22 }

</bundles_post_ra>
